<compile_context>
chip_gen: v5e
topology: v5e:2x2
jax: 0.10.0
libtpu: 0.0.40
codegen_flags: <defaults>
</compile_context>

<pallas_src>
import math

import jax
import jax.numpy as jnp
from jax import lax
from jax.experimental import pallas as pl
from jax.experimental.pallas import tpu as pltpu


def _round_up(v, m):
    return (v + m - 1) // m * m


def gcn_forward(x, adj, w1, b1, w2, b2):
    """x: (B, N, nfeat) f32, adj: (N, N) f32. Returns (B, N, outfeat) f32."""
    B, N, nfeat = x.shape
    nhid = w1.shape[1]
    outfeat = w2.shape[1]

    LANE = 128
    Fp = _round_up(nfeat, LANE)
    Hp = _round_up(nhid, LANE)
    Op = _round_up(outfeat, LANE)

    # ---- wrapper-side glue: lane-dense zero padding + bf16 operand casts ----
    x_bf = jnp.zeros((B, N, Fp), jnp.bfloat16).at[:, :, :nfeat].set(
        x.astype(jnp.bfloat16))
    x2d = x_bf.reshape(B * N, Fp)                       # batch folded into rows
    adj_bf = adj.astype(jnp.bfloat16)                   # NOT transposed
    w1p = jnp.zeros((Fp, Hp), jnp.bfloat16).at[:nfeat, :nhid].set(
        w1.astype(jnp.bfloat16))
    w2p = jnp.zeros((Hp, Op), jnp.bfloat16).at[:nhid, :outfeat].set(
        w2.astype(jnp.bfloat16))
    b1p = jnp.zeros((1, Hp), jnp.float32).at[0, :nhid].set(b1)
    b2p = jnp.zeros((1, Op), jnp.float32).at[0, :outfeat].set(b2)

    def kernel(x_ref, adj_ref, w1_ref, b1_ref, w2_ref, b2_ref, o_ref, h1_ref):
        adj_v = adj_ref[...]                            # (N, N) bf16
        b1_v = b1_ref[...]                              # (1, Hp) f32
        b2_v = b2_ref[...]                              # (1, Op) f32

        # gc1 weight matmul for the whole batch: (B*N, Fp) @ (Fp, Hp), f32 acc.
        s1 = jnp.dot(x_ref[...], w1_ref[...],
                     preferred_element_type=jnp.float32).astype(jnp.bfloat16)

        # Adjacency contraction per batch element.  adj.T is never built:
        #   h1[n, h] = sum_m adj[m, n] * s1[m, h]
        adjT_dims = (((0,), (0,)), ((), ()))
        for b in range(B):                              # B is small & static
            s1_b = s1[b * N:(b + 1) * N, :]
            h1_b = lax.dot_general(adj_v, s1_b, adjT_dims,
                                   preferred_element_type=jnp.float32)
            h1_b = jnp.maximum(h1_b + b1_v, 0.0)        # bias + relu in f32
            # dropout(p=0, eval mode) is a no-op.
            h1_ref[b * N:(b + 1) * N, :] = h1_b.astype(jnp.bfloat16)

        # gc2 weight matmul for the whole batch: (B*N, Hp) @ (Hp, Op), f32 acc.
        s2 = jnp.dot(h1_ref[...], w2_ref[...],
                     preferred_element_type=jnp.float32).astype(jnp.bfloat16)

        for b in range(B):
            s2_b = s2[b * N:(b + 1) * N, :]
            h2_b = lax.dot_general(adj_v, s2_b, adjT_dims,
                                   preferred_element_type=jnp.float32) + b2_v
            # log_softmax over the node axis (torch dim=1), computed in f32.
            m = jnp.max(h2_b, axis=0, keepdims=True)
            z = h2_b - m
            lse = jnp.log(jnp.sum(jnp.exp(z), axis=0, keepdims=True))
            o_ref[b * N:(b + 1) * N, :] = (z - lse).astype(o_ref.dtype)

    # Advisory cost estimate so XLA can overlap surrounding ops with the kernel.
    flops = 2 * B * N * (Fp * Hp + N * Hp + Hp * Op + N * Op)
    transcendentals = B * N * Op + B * Op
    bytes_accessed = (2 * (B * N * Fp + N * N + Fp * Hp + Hp * Op)   # bf16 in
                      + 4 * (Hp + Op)                                # f32 biases
                      + 4 * B * N * Op)                              # f32 out

    out2d = pl.pallas_call(
        kernel,
        out_shape=jax.ShapeDtypeStruct((B * N, Op), jnp.float32),
        grid=(1,),
        in_specs=[
            pl.BlockSpec((B * N, Fp), lambda i: (0, 0)),
            pl.BlockSpec((N, N), lambda i: (0, 0)),
            pl.BlockSpec((Fp, Hp), lambda i: (0, 0)),
            pl.BlockSpec((1, Hp), lambda i: (0, 0)),
            pl.BlockSpec((Hp, Op), lambda i: (0, 0)),
            pl.BlockSpec((1, Op), lambda i: (0, 0)),
        ],
        out_specs=pl.BlockSpec((B * N, Op), lambda i: (0, 0)),
        scratch_shapes=[pltpu.VMEM((B * N, Hp), jnp.bfloat16)],
        compiler_params=pltpu.CompilerParams(
            dimension_semantics=("arbitrary",)),
        cost_estimate=pl.CostEstimate(
            flops=flops, transcendentals=transcendentals,
            bytes_accessed=bytes_accessed),
    )(x2d, adj_bf, w1p, b1p, w2p, b2p)

    # wrapper-side glue: restore (B, N, outfeat) and drop the lane padding.
    return out2d.reshape(B, N, Op)[:, :, :outfeat]


def _init_gc_params(key, in_features, out_features):
    """Mirror GraphConvolution.reset_parameters: U(-stdv, stdv), stdv=1/sqrt(out)."""
    stdv = 1.0 / math.sqrt(out_features)
    kw, kb = jax.random.split(key)
    w = jax.random.uniform(kw, (in_features, out_features), jnp.float32,
                           minval=-stdv, maxval=stdv)
    b = jax.random.uniform(kb, (out_features,), jnp.float32,
                           minval=-stdv, maxval=stdv)
    return w, b


def _make_adjacency(n_nodes):
    # TODO(synk): the `Graph` class is not provided in the module source; build a
    # deterministic symmetric-normalized ring+self-loop adjacency as a stand-in.
    a = jnp.eye(n_nodes, dtype=jnp.float32)
    idx = jnp.arange(n_nodes)
    a = a.at[idx, (idx + 1) % n_nodes].set(1.0)
    a = a.at[idx, (idx - 1) % n_nodes].set(1.0)
    deg = jnp.sum(a, axis=1)
    d_inv_sqrt = 1.0 / jnp.sqrt(deg)
    return a * d_inv_sqrt[:, None] * d_inv_sqrt[None, :]


if __name__ == "__main__":
    B, N = 2, 16          # batch, number of graph nodes
    nfeat, nhid, outfeat = 16, 32, 16

    key = jax.random.PRNGKey(0)
    kx, k1, k2 = jax.random.split(key, 3)

    x = jax.random.normal(kx, (B, N, nfeat), jnp.float32)
    adj = _make_adjacency(N)
    w1, b1 = _init_gc_params(k1, nfeat, nhid)
    w2, b2 = _init_gc_params(k2, nhid, outfeat)

    out = gcn_forward(x, adj, w1, b1, w2, b2)
    jax.block_until_ready(out)

    # --- reference 1: same bf16-operand / f32-accumulate numerics as the kernel ---
    bf, f32 = jnp.bfloat16, jnp.float32
    s1 = jnp.einsum("bnf,fh->bnh", x.astype(bf), w1.astype(bf),
                    preferred_element_type=f32).astype(bf)
    h1 = jnp.maximum(jnp.einsum("mn,bmh->bnh", adj.astype(bf), s1,
                                preferred_element_type=f32) + b1, 0.0).astype(bf)
    s2 = jnp.einsum("bnh,ho->bno", h1, w2.astype(bf),
                    preferred_element_type=f32).astype(bf)
    h2 = jnp.einsum("mn,bmo->bno", adj.astype(bf), s2,
                    preferred_element_type=f32) + b2
    ref_bf = jax.nn.log_softmax(h2, axis=1)
    assert jnp.allclose(out, ref_bf, atol=1e-3, rtol=1e-3), \
        "mismatch vs bf16-matched reference"

    # --- reference 2: full-f32 semantics of the PyTorch module (loose tolerance) ---
    s1f = jnp.einsum("bnf,fh->bnh", x, w1)
    h1f = jax.nn.relu(jnp.einsum("mn,bmh->bnh", adj, s1f) + b1)
    s2f = jnp.einsum("bnh,ho->bno", h1f, w2)
    h2f = jnp.einsum("mn,bmo->bno", adj, s2f) + b2
    ref_f32 = jax.nn.log_softmax(h2f, axis=1)
    assert jnp.allclose(out, ref_f32, atol=5e-2, rtol=5e-2), \
        "mismatch vs f32 reference"

    print("KERNEL_OK")
</pallas_src>

<mosaic_0001>
module attributes {stable_mosaic.version = 11 : i64} {
  func.func @kernel(%arg0: i32, %arg1: memref<32x128xbf16, #tpu.memory_space<vmem>>, %arg2: memref<16x16xbf16, #tpu.memory_space<vmem>>, %arg3: memref<128x128xbf16, #tpu.memory_space<vmem>>, %arg4: memref<1x128xf32, #tpu.memory_space<vmem>>, %arg5: memref<128x128xbf16, #tpu.memory_space<vmem>>, %arg6: memref<1x128xf32, #tpu.memory_space<vmem>>, %arg7: memref<32x128xf32, #tpu.memory_space<vmem>>, %arg8: memref<32x128xbf16, #tpu.memory_space<vmem>>) attributes {dimension_semantics = [#tpu.dimension_semantics<arbitrary>], iteration_bounds = array<i64: 1>, scalar_prefetch = 0 : i64, scratch_operands = 1 : i64, tpu.core_type = #tpu.core_type<tc>, window_params = [{pipeline_mode = #tpu.pipeline_mode<synchronous>, transform_indices = @transform_0, window_bounds = array<i64: 32, 128>}, {pipeline_mode = #tpu.pipeline_mode<synchronous>, transform_indices = @transform_1, window_bounds = array<i64: 16, 16>}, {pipeline_mode = #tpu.pipeline_mode<synchronous>, transform_indices = @transform_2, window_bounds = array<i64: 128, 128>}, {pipeline_mode = #tpu.pipeline_mode<synchronous>, transform_indices = @transform_3, window_bounds = array<i64: 1, 128>}, {pipeline_mode = #tpu.pipeline_mode<synchronous>, transform_indices = @transform_4, window_bounds = array<i64: 128, 128>}, {pipeline_mode = #tpu.pipeline_mode<synchronous>, transform_indices = @transform_5, window_bounds = array<i64: 1, 128>}, {pipeline_mode = #tpu.pipeline_mode<synchronous>, transform_indices = @transform_6, window_bounds = array<i64: 32, 128>}]} {
    %c0 = arith.constant 0 : index
    %c0_0 = arith.constant 0 : index
    %0 = vector.load %arg2[%c0, %c0_0] : memref<16x16xbf16, #tpu.memory_space<vmem>>, vector<16x16xbf16>
    %c0_1 = arith.constant 0 : index
    %c0_2 = arith.constant 0 : index
    %1 = vector.load %arg4[%c0_1, %c0_2] : memref<1x128xf32, #tpu.memory_space<vmem>>, vector<1x128xf32>
    %c0_3 = arith.constant 0 : index
    %c0_4 = arith.constant 0 : index
    %2 = vector.load %arg6[%c0_3, %c0_4] : memref<1x128xf32, #tpu.memory_space<vmem>>, vector<1x128xf32>
    %c0_5 = arith.constant 0 : index
    %c0_6 = arith.constant 0 : index
    %3 = vector.load %arg1[%c0_5, %c0_6] : memref<32x128xbf16, #tpu.memory_space<vmem>>, vector<32x128xbf16>
    %c0_7 = arith.constant 0 : index
    %c0_8 = arith.constant 0 : index
    %4 = vector.load %arg3[%c0_7, %c0_8] : memref<128x128xbf16, #tpu.memory_space<vmem>>, vector<128x128xbf16>
    %cst = arith.constant dense<0.000000e+00> : vector<32x128xf32>
    %5 = tpu.matmul %3, %4, %cst {dimension_numbers = #tpu.dot_dimension_numbers<[1], [0], [0], [1], [0, 0, 1, 1], [], []>} : vector<32x128xbf16>, vector<128x128xbf16>, vector<32x128xf32> -> vector<32x128xf32>
    %6 = arith.truncf %5 : vector<32x128xf32> to vector<32x128xbf16>
    %7 = vector.extract_strided_slice %6 {offsets = [0, 0], sizes = [16, 128], strides = [1, 1]} : vector<32x128xbf16> to vector<16x128xbf16>
    %cst_9 = arith.constant dense<0.000000e+00> : vector<16x128xf32>
    %8 = tpu.matmul %0, %7, %cst_9 {dimension_numbers = #tpu.dot_dimension_numbers<[0], [0], [1], [1], [0, 1, 1, 1], [], []>} : vector<16x16xbf16>, vector<16x128xbf16>, vector<16x128xf32> -> vector<16x128xf32>
    %9 = vector.broadcast %1 : vector<1x128xf32> to vector<16x128xf32>
    %10 = arith.addf %8, %9 : vector<16x128xf32>
    %cst_10 = arith.constant 0.000000e+00 : f32
    %11 = vector.broadcast %cst_10 : f32 to vector<16x128xf32>
    %12 = arith.maximumf %10, %11 : vector<16x128xf32>
    %13 = arith.truncf %12 : vector<16x128xf32> to vector<16x128xbf16>
    %c0_11 = arith.constant 0 : index
    %c0_12 = arith.constant 0 : index
    %14 = vector.load %arg8[%c0_11, %c0_12] : memref<32x128xbf16, #tpu.memory_space<vmem>>, vector<16x128xbf16>
    tpu.vector_store %arg8[%c0_11, %c0_12], %13 {strides = array<i32>} : memref<32x128xbf16, #tpu.memory_space<vmem>>, vector<16x128xbf16>,
    %15 = vector.extract_strided_slice %6 {offsets = [16, 0], sizes = [16, 128], strides = [1, 1]} : vector<32x128xbf16> to vector<16x128xbf16>
    %cst_13 = arith.constant dense<0.000000e+00> : vector<16x128xf32>
    %16 = tpu.matmul %0, %15, %cst_13 {dimension_numbers = #tpu.dot_dimension_numbers<[0], [0], [1], [1], [0, 1, 1, 1], [], []>} : vector<16x16xbf16>, vector<16x128xbf16>, vector<16x128xf32> -> vector<16x128xf32>
    %17 = vector.broadcast %1 : vector<1x128xf32> to vector<16x128xf32>
    %18 = arith.addf %16, %17 : vector<16x128xf32>
    %cst_14 = arith.constant 0.000000e+00 : f32
    %19 = vector.broadcast %cst_14 : f32 to vector<16x128xf32>
    %20 = arith.maximumf %18, %19 : vector<16x128xf32>
    %21 = arith.truncf %20 : vector<16x128xf32> to vector<16x128xbf16>
    %c16 = arith.constant 16 : index
    %c0_15 = arith.constant 0 : index
    %22 = vector.load %arg8[%c16, %c0_15] : memref<32x128xbf16, #tpu.memory_space<vmem>>, vector<16x128xbf16>
    tpu.vector_store %arg8[%c16, %c0_15], %21 {strides = array<i32>} : memref<32x128xbf16, #tpu.memory_space<vmem>>, vector<16x128xbf16>,
    %c0_16 = arith.constant 0 : index
    %c0_17 = arith.constant 0 : index
    %23 = vector.load %arg8[%c0_16, %c0_17] : memref<32x128xbf16, #tpu.memory_space<vmem>>, vector<32x128xbf16>
    %c0_18 = arith.constant 0 : index
    %c0_19 = arith.constant 0 : index
    %24 = vector.load %arg5[%c0_18, %c0_19] : memref<128x128xbf16, #tpu.memory_space<vmem>>, vector<128x128xbf16>
    %cst_20 = arith.constant dense<0.000000e+00> : vector<32x128xf32>
    %25 = tpu.matmul %23, %24, %cst_20 {dimension_numbers = #tpu.dot_dimension_numbers<[1], [0], [0], [1], [0, 0, 1, 1], [], []>} : vector<32x128xbf16>, vector<128x128xbf16>, vector<32x128xf32> -> vector<32x128xf32>
    %26 = arith.truncf %25 : vector<32x128xf32> to vector<32x128xbf16>
    %27 = vector.extract_strided_slice %26 {offsets = [0, 0], sizes = [16, 128], strides = [1, 1]} : vector<32x128xbf16> to vector<16x128xbf16>
    %cst_21 = arith.constant dense<0.000000e+00> : vector<16x128xf32>
    %28 = tpu.matmul %0, %27, %cst_21 {dimension_numbers = #tpu.dot_dimension_numbers<[0], [0], [1], [1], [0, 1, 1, 1], [], []>} : vector<16x16xbf16>, vector<16x128xbf16>, vector<16x128xf32> -> vector<16x128xf32>
    %29 = vector.broadcast %2 : vector<1x128xf32> to vector<16x128xf32>
    %30 = arith.addf %28, %29 : vector<16x128xf32>
    %cst_22 = arith.constant dense<0xFF800000> : vector<128xf32>
    %31 = vector.multi_reduction <maximumf>, %30, %cst_22 [0] : vector<16x128xf32> to vector<128xf32>
    %32 = vector.shape_cast %31 : vector<128xf32> to vector<1x128xf32>
    %33 = vector.broadcast %32 : vector<1x128xf32> to vector<16x128xf32>
    %34 = arith.subf %30, %33 : vector<16x128xf32>
    %35 = math.exp %34 : vector<16x128xf32>
    %cst_23 = arith.constant dense<0.000000e+00> : vector<128xf32>
    %36 = vector.multi_reduction <add>, %35, %cst_23 [0] : vector<16x128xf32> to vector<128xf32>
    %37 = vector.shape_cast %36 : vector<128xf32> to vector<1x128xf32>
    %38 = math.log %37 : vector<1x128xf32>
    %39 = vector.broadcast %38 : vector<1x128xf32> to vector<16x128xf32>
    %40 = arith.subf %34, %39 : vector<16x128xf32>
    %c0_24 = arith.constant 0 : index
    %c0_25 = arith.constant 0 : index
    %41 = vector.load %arg7[%c0_24, %c0_25] : memref<32x128xf32, #tpu.memory_space<vmem>>, vector<16x128xf32>
    tpu.vector_store %arg7[%c0_24, %c0_25], %40 {strides = array<i32>} : memref<32x128xf32, #tpu.memory_space<vmem>>, vector<16x128xf32>,
    %42 = vector.extract_strided_slice %26 {offsets = [16, 0], sizes = [16, 128], strides = [1, 1]} : vector<32x128xbf16> to vector<16x128xbf16>
    %cst_26 = arith.constant dense<0.000000e+00> : vector<16x128xf32>
    %43 = tpu.matmul %0, %42, %cst_26 {dimension_numbers = #tpu.dot_dimension_numbers<[0], [0], [1], [1], [0, 1, 1, 1], [], []>} : vector<16x16xbf16>, vector<16x128xbf16>, vector<16x128xf32> -> vector<16x128xf32>
    %44 = vector.broadcast %2 : vector<1x128xf32> to vector<16x128xf32>
    %45 = arith.addf %43, %44 : vector<16x128xf32>
    %cst_27 = arith.constant dense<0xFF800000> : vector<128xf32>
    %46 = vector.multi_reduction <maximumf>, %45, %cst_27 [0] : vector<16x128xf32> to vector<128xf32>
    %47 = vector.shape_cast %46 : vector<128xf32> to vector<1x128xf32>
    %48 = vector.broadcast %47 : vector<1x128xf32> to vector<16x128xf32>
    %49 = arith.subf %45, %48 : vector<16x128xf32>
    %50 = math.exp %49 : vector<16x128xf32>
    %cst_28 = arith.constant dense<0.000000e+00> : vector<128xf32>
    %51 = vector.multi_reduction <add>, %50, %cst_28 [0] : vector<16x128xf32> to vector<128xf32>
    %52 = vector.shape_cast %51 : vector<128xf32> to vector<1x128xf32>
    %53 = math.log %52 : vector<1x128xf32>
    %54 = vector.broadcast %53 : vector<1x128xf32> to vector<16x128xf32>
    %55 = arith.subf %49, %54 : vector<16x128xf32>
    %c16_29 = arith.constant 16 : index
    %c0_30 = arith.constant 0 : index
    %56 = vector.load %arg7[%c16_29, %c0_30] : memref<32x128xf32, #tpu.memory_space<vmem>>, vector<16x128xf32>
    tpu.vector_store %arg7[%c16_29, %c0_30], %55 {strides = array<i32>} : memref<32x128xf32, #tpu.memory_space<vmem>>, vector<16x128xf32>,
    return
  }
  func.func @transform_0(%arg0: i32) -> (i32, i32) {
    %c0_i32 = arith.constant 0 : i32
    %c0_i32_0 = arith.constant 0 : i32
    %c0_i32_1 = arith.constant 0 : i32
    return %c0_i32, %c0_i32_0 : i32, i32
  }
  func.func @transform_1(%arg0: i32) -> (i32, i32) {
    %c0_i32 = arith.constant 0 : i32
    %c0_i32_0 = arith.constant 0 : i32
    %c0_i32_1 = arith.constant 0 : i32
    return %c0_i32, %c0_i32_0 : i32, i32
  }
  func.func @transform_2(%arg0: i32) -> (i32, i32) {
    %c0_i32 = arith.constant 0 : i32
    %c0_i32_0 = arith.constant 0 : i32
    %c0_i32_1 = arith.constant 0 : i32
    return %c0_i32, %c0_i32_0 : i32, i32
  }
  func.func @transform_3(%arg0: i32) -> (i32, i32) {
    %c0_i32 = arith.constant 0 : i32
    %c0_i32_0 = arith.constant 0 : i32
    %c0_i32_1 = arith.constant 0 : i32
    return %c0_i32, %c0_i32_0 : i32, i32
  }
  func.func @transform_4(%arg0: i32) -> (i32, i32) {
    %c0_i32 = arith.constant 0 : i32
    %c0_i32_0 = arith.constant 0 : i32
    %c0_i32_1 = arith.constant 0 : i32
    return %c0_i32, %c0_i32_0 : i32, i32
  }
  func.func @transform_5(%arg0: i32) -> (i32, i32) {
    %c0_i32 = arith.constant 0 : i32
    %c0_i32_0 = arith.constant 0 : i32
    %c0_i32_1 = arith.constant 0 : i32
    return %c0_i32, %c0_i32_0 : i32, i32
  }
  func.func @transform_6(%arg0: i32) -> (i32, i32) {
    %c0_i32 = arith.constant 0 : i32
    %c0_i32_0 = arith.constant 0 : i32
    %c0_i32_1 = arith.constant 0 : i32
    return %c0_i32, %c0_i32_0 : i32, i32
  }
}

</mosaic_0001>

<bundles_post_ra>
// kernel: tpu_custom_call.1
= control target key start
LH: loop header
LB: loop body
LE: loop exit
PB: predicated region body
PF: predicated region fallthrough
CT: control target
= control target key end

     0   :  { %11 = vsyncpa [#allocation4], 0  ;;  %s836_s0 = inlined_call_operand.hbm [shape: bf16[32,128], index: 0, kind: input, shape index: {}]   ;;  %s837_s1 = inlined_call_operand.hbm [shape: bf16[16,16], index: 1, kind: input, shape index: {}]   ;;  %s838_s2 = inlined_call_operand.hbm [shape: bf16[128,128], index: 2, kind: input, shape index: {}]   ;;  %s839_s3 = inlined_call_operand.vmem [shape: f32[1,128], index: 3, kind: input, shape index: {}]   ;;  %s840_s4 = inlined_call_operand.hbm [shape: bf16[128,128], index: 4, kind: input, shape index: {}]   ;;  %s841_s5 = inlined_call_operand.vmem [shape: f32[1,128], index: 5, kind: input, shape index: {}]   ;;  %s842_s6 = inlined_call_operand.hbm [shape: f32[32,128], index: 6, kind: output, shape index: {}]  }
   0x1   :  { %12 = vsyncpa [#allocation7], 0 }
   0x2   :  { %13 = vsyncpa [#allocation10], 0 }
   0x3   :  { %14 = vsyncpa [#allocation5], 0  ;;  %s32_s23 = sshll.u32 %s837_s1, 4  ;;  %s767_s24 = smov [#allocation6]   ;;  %s33_s23 = int_to_ptr.hbm [resolvable:$true] %s32_s23 }
   0x4   :  { %s34_s25 = sshll.u32 %s767_s24, 4  ;;  %s19_s28 = sshll.u32 %s836_s0, 4  ;;  %s35_s25 = int_to_ptr.vmem [resolvable:$true] %s34_s25  ;;  %s20_s28 = int_to_ptr.hbm [resolvable:$true] %s19_s28 }
   0x5   :  { %s768_s29 = smov 64   ;;  %s769_s30 = smov 4  }
   0x6   :  { %40 = dma.hbm_to_vmem [thread:$0]  %s33_s23, 128, %s35_s25, [#allocation7], %s768_s29, %s768_s29, %s769_s30  }
   0x7   :  { %s770_s7 = smov [#allocation3]   ;;  %s45_s11 = sshll.u32 %s838_s2, 4  ;;  %s46_s11 = int_to_ptr.hbm [resolvable:$true] %s45_s11 }
   0x8   :  { %s21_s8 = sshll.u32 %s770_s7, 4  ;;  %s60_s13 = sshll.u32 %s840_s4, 4  ;;  %s22_s8 = int_to_ptr.vmem [resolvable:$true] %s21_s8  ;;  %s61_s13 = int_to_ptr.hbm [resolvable:$true] %s60_s13 }
   0x9   :  { %27 = dma.hbm_to_vmem [thread:$0]  %s20_s28, 256, %s22_s8, [#allocation4], %s768_s29, %s768_s29, %s769_s30  }
   0xa   :  { %s771_s14 = smov [#allocation8]   ;;  %s772_s0 = smov [#allocation9]  }
   0xb   :  { %s47_s15 = sshll.u32 %s771_s14, 4  ;;  %s62_s16 = sshll.u32 %s772_s0, 4  ;;  %s48_s15 = int_to_ptr.vmem [resolvable:$true] %s47_s15  ;;  %s63_s16 = int_to_ptr.vmem [resolvable:$true] %s62_s16 }
   0xc   :  { %53 = dma.hbm_to_vmem [thread:$0]  %s46_s11, 1024, %s48_s15, [#allocation7], %s768_s29, %s768_s29, %s769_s30  }
   0xd   :  { %68 = dma.hbm_to_vmem [thread:$0]  %s61_s13, 1024, %s63_s16, [#allocation10], %s768_s29, %s768_s29, %s769_s30  }
   0xe   :  { %759 = dma.done.wait [#allocation4], 256  }
   0xf   :  { %760 = vsyncadd [#allocation4], 4294967040 }
  0x10   :  { %761 = dma.done.wait [#allocation7], 1152  }
  0x11   :  { %762 = vsyncadd [#allocation7], 4294966144 }
  0x12   :  { %763 = dma.done.wait [#allocation10], 1024  }
  0x13   :  { %764 = vsyncadd [#allocation10], 4294966272  ;;  %v593_v0 = vld [vmem:[#allocation8 + $0x38] sm:$0xff]  ;;  %v592_v2 = vld [vmem:[#allocation8 + $0x30] sm:$0xff]  ;;  %vm226_vm0 = vcmask 130048   ;;  %s480_s21 = sshll.u32 %s842_s6, 4  ;;  %s481_s21 = int_to_ptr.hbm [resolvable:$true] %s480_s21 }
  0x14   :  { %v583_v1 = vld [vmem:[#allocation6] sm:$0xff]  ;;  %172 = vmatpush.bf16.msra.mxu0 %v593_v0  ;;  %v591_v3 = vld [vmem:[#allocation8 + $0x28] sm:$0xff]  ;;  %v590_v4 = vld [vmem:[#allocation8 + $0x20] sm:$0xff]  ;;  %s774_s22 = smov 128   ;;  %s775_s23 = smov 8  }
  0x15   :  { %204 = vxpose.xlu0.c.b16.start.end [1/1] (short) (narrow) %v583_v1, 16  ;;  %v589_v5 = vld [vmem:[#allocation8 + $0x18] sm:$0xff]  ;;  %v588_v6 = vld [vmem:[#allocation8 + $0x10] sm:$0xff]  ;;  %v587_v7 = vld [vmem:[#allocation8 + $0x8] sm:$0xff] }
  0x16   :  { %v586_v8 = vld [vmem:[#allocation8] sm:$0xff]  ;;  %v584_v9 = vld [vmem:[#allocation3] sm:$0xff]  ;;  %v585_v10 = vld [vmem:[#allocation3 + $0x8] sm:$0xff] }
  0x17   :  { %v603_v12 = vld [vmem:[#allocation9 + $0x38] sm:$0xff]  ;;  %v602_v13 = vld [vmem:[#allocation9 + $0x30] sm:$0xff]  ;;  %v601_v28 = vld [vmem:[#allocation9 + $0x28] sm:$0xff] }
  0x18   :  { %173 = vmatpush.bf16.msra.mxu0 %v592_v2  ;;  %356 = vmatpush.bf16.msra.mxu3 %v603_v12  ;;  %v600_v29 = vld [vmem:[#allocation9 + $0x20] sm:$0xff]  ;;  %v599_v30 = vld [vmem:[#allocation9 + $0x18] sm:$0xff]  ;;  %v598_v31 = vld [vmem:[#allocation9 + $0x10] sm:$0xff] }
  0x19   :  { %v597_v32 = vld [vmem:[#allocation9 + $0x8] sm:$0xff]  ;;  %v596_v33 = vld [vmem:[#allocation9] sm:$0xff]  ;;  %v625_v35 = vld [vmem:[%s839_s3] ss:$0 sm:$0xff] }
  0x1a   :  { %v626_v2 = vld [vmem:[%s841_s5] ss:$0 sm:$0xff]  ;;  %s773_s5 = smov [#allocation11]  }
  0x1b   :  { %s478_s18 = sshll.u32 %s773_s5, 4  ;;  %s479_s18 = int_to_ptr.vmem [resolvable:$true] %s478_s18 }
  0x1c   :  { %174 = vmatpush.bf16.msra.mxu0 %v591_v3  ;;  %357 = vmatpush.bf16.msra.mxu3 %v602_v13 }
  0x20   :  { %175 = vmatpush.bf16.msra.mxu0 %v590_v4  ;;  %358 = vmatpush.bf16.msra.mxu3 %v601_v28 }
  0x24   :  { %176 = vmatpush.bf16.msra.mxu0 %v589_v5  ;;  %359 = vmatpush.bf16.msra.mxu3 %v600_v29 }
  0x28   :  { %177 = vmatpush.bf16.msra.mxu0 %v588_v6  ;;  %360 = vmatpush.bf16.msra.mxu3 %v599_v30 }
  0x2c   :  { %178 = vmatpush.bf16.msra.mxu0 %v587_v7  ;;  %361 = vmatpush.bf16.msra.mxu3 %v598_v31 }
  0x30   :  { %179 = vmatpush.bf16.msra.mxu0 %v586_v8  ;;  %362 = vmatpush.bf16.msra.mxu3 %v597_v32 }
  0x33   :  { %180 = vmatmul.bf16.vlgmr.msra.gmra.mxu0 %v584_v9 }
  0x34   :  { %363 = vmatpush.bf16.msra.mxu3 %v596_v33 }
  0x43   :  { %185 = vmatmul.bf16.gmra.mxu0 %v585_v10 }
  0xb0   :  { %v181_v11 = vpop.f32.mrf.mxu0 }
  0xb1   :  { %v191_v14 = vpack.c.bf16 %v181_v11, %v181_v11 }
  0xb3   :  { %v222_v17 = vunpack.c.l.b16 %v191_v14 }
  0xb8   :  { %v183_v15 = vpop.f32.mrf.mxu0 }
  0xb9   :  { %v192_v16 = vpack.c.bf16 %v183_v15, %v183_v15 }
  0xbb   :  { %v223_v18 = vunpack.c.l.b16 %v192_v16 }
  0xbd   :  { %v224_v19 = vpack.c.b16 %v223_v18, %v222_v17 }
  0xbf   :  { %237 = vmatpush.bf16.msra.mxu1 %v224_v19 }
  0xc0   :  { %v186_v20 = vpop.f32.mrf.mxu0 }
  0xc1   :  { %v212_v21 = vpop.trf.xlu0  ;;  %v193_v22 = vpack.c.bf16 %v186_v20, %v186_v20 }
  0xc2   :  { %539 = vmatmul.msk.bf16.vlgmr.msra.gmra.mxu1 %vm226_vm0, %v212_v21 }
  0xc3   :  { %v252_v25 = vunpack.c.l.b16 %v193_v22 }
  0xc8   :  { %v188_v23 = vpop.f32.mrf.mxu0 }
  0xc9   :  { %v194_v24 = vpack.c.bf16 %v188_v23, %v188_v23 }
  0xcb   :  { %v253_v26 = vunpack.c.l.b16 %v194_v24 }
  0xcd   :  { %v254_v27 = vpack.c.b16 %v253_v26, %v252_v25 }
  0xcf   :  { %263 = vmatpush.bf16.msra.mxu2 %v254_v27 }
  0xd2   :  { %540 = vmatmul.msk.bf16.vlgmr.msra.gmra.mxu2 %vm226_vm0, %v212_v21 }
 0x13f   :  { %v239_v34 = vpop.f32.mrf.mxu1 }
 0x140   :  { %v240_v36 = vadd.f32 %v625_v35, %v239_v34 }
 0x142   :  { %v244_v39 = vmax.f32 %v240_v36, 0.0 }
 0x147   :  { %v241_v37 = vpop.f32.mrf.mxu1 }
 0x148   :  { %v242_v38 = vadd.f32 %v625_v35, %v241_v37 }
 0x14a   :  { %v245_v40 = vmax.f32 %v242_v38, 0.0 }
 0x14c   :  { %v607_v41 = vpack.c.bf16 %v245_v40, %v244_v39 }
 0x14e   :  { %608 = vst [vmem:[#allocation2] sm:$0xff] %v607_v41  }
 0x155   :  { %v265_v42 = vpop.f32.mrf.mxu2  ;;  %v594_v43 = vld [vmem:[#allocation2] sm:$0xff] }
 0x156   :  { %364 = vmatmul.bf16.vlgmr.msra.gmra.mxu3 %v594_v43  ;;  %v266_v44 = vadd.f32 %v625_v35, %v265_v42 }
 0x158   :  { %v270_v47 = vmax.f32 %v266_v44, 0.0 }
 0x15d   :  { %v267_v45 = vpop.f32.mrf.mxu2 }
 0x15e   :  { %v268_v46 = vadd.f32 %v625_v35, %v267_v45 }
 0x160   :  { %v271_v48 = vmax.f32 %v268_v46, 0.0 }
 0x162   :  { %v612_v49 = vpack.c.bf16 %v271_v48, %v270_v47 }
 0x164   :  { %614 = vst [vmem:[#allocation2 + $0x8] sm:$0xff] %v612_v49  }
 0x16b   :  { %v595_v50 = vld [vmem:[#allocation2 + $0x8] sm:$0xff] }
 0x16c   :  { %369 = vmatmul.bf16.gmra.mxu3 %v595_v50 }
 0x1d9   :  { %v365_v51 = vpop.f32.mrf.mxu3 }
 0x1da   :  { %v375_v52 = vpack.c.bf16 %v365_v51, %v365_v51 }
 0x1dc   :  { %v384_v55 = vunpack.c.l.b16 %v375_v52 }
 0x1e1   :  { %v367_v53 = vpop.f32.mrf.mxu3 }
 0x1e2   :  { %v376_v54 = vpack.c.bf16 %v367_v53, %v367_v53 }
 0x1e4   :  { %v385_v56 = vunpack.c.l.b16 %v376_v54 }
 0x1e6   :  { %v386_v57 = vpack.c.b16 %v385_v56, %v384_v55 }
 0x1e8   :  { %395 = vmatpush.bf16.msrb.mxu1 %v386_v57 }
 0x1eb   :  { %581 = vmatmul.msk.bf16.vlgmr.msrb.gmra.mxu1 %vm226_vm0, %v212_v21 }
 0x1ef   :  { %v370_v58 = vpop.f32.mrf.mxu3 }
 0x1f0   :  { %v377_v59 = vpack.c.bf16 %v370_v58, %v370_v58 }
 0x1f2   :  { %v430_v62 = vunpack.c.l.b16 %v377_v59 }
 0x1f7   :  { %v372_v60 = vpop.f32.mrf.mxu3 }
 0x1f8   :  { %v378_v61 = vpack.c.bf16 %v372_v60, %v372_v60 }
 0x1fa   :  { %v431_v63 = vunpack.c.l.b16 %v378_v61 }
 0x1fc   :  { %v432_v0 = vpack.c.b16 %v431_v63, %v430_v62 }
 0x1fe   :  { %441 = vmatpush.bf16.msrb.mxu2 %v432_v0 }
 0x201   :  { %582 = vmatmul.msk.bf16.vlgmr.msrb.gmra.mxu2 %vm226_vm0, %v212_v21 }
 0x268   :  { %v397_v1 = vpop.f32.mrf.mxu1 }
 0x269   :  { %v398_v4 = vadd.f32 %v626_v2, %v397_v1 }
 0x270   :  { %v399_v3 = vpop.f32.mrf.mxu1 }
 0x271   :  { %v400_v5 = vadd.f32 %v626_v2, %v399_v3 }
 0x273   :  { %v402_v6 = vmax.f32 %v398_v4, %v400_v5 }
 0x275   :  { %v403_v7 = vrot.slane %v402_v6, 4 }
 0x277   :  { %v404_v8 = vmax.f32 %v402_v6, %v403_v7 }
 0x279   :  { %v405_v9 = vrot.slane %v404_v8, 2 }
 0x27b   :  { %v406_v10 = vmax.f32 %v404_v8, %v405_v9 }
 0x27d   :  { %v407_v11 = vrot.slane %v406_v10, 1 }
 0x27f   :  { %v408_v12 = vmax.f32 %v406_v10, %v407_v11 }
 0x281   :  { %v409_v13 = vsub.f32 %v398_v4, %v408_v12  ;;  %v410_v14 = vsub.f32 %v400_v5, %v408_v12 }
 0x283   :  { %v411_v15 = vmul.f32 1.442695, %v409_v13  ;;  %v413_v16 = vmul.f32 1.442695, %v410_v14 }
 0x284   :  { %v443_v17 = vpop.f32.mrf.mxu2 }
 0x285   :  { %627 = vpow2.f32 %v411_v15  ;;  %v444_v22 = vadd.f32 %v626_v2, %v443_v17 }
 0x286   :  { %629 = vpow2.f32 %v413_v16 }
 0x28b   :  { %v628_v18 = vpop.eup %627 }
 0x28c   :  { %v630_v19 = vpop.eup %629  ;;  %v445_v20 = vpop.f32.mrf.mxu2 }
 0x28d   :  { %v415_v21 = vadd.f32 %v630_v19, %v628_v18  ;;  %v446_v23 = vadd.f32 %v626_v2, %v445_v20 }
 0x28f   :  { %v416_v24 = vrot.slane %v415_v21, 4  ;;  %v448_v25 = vmax.f32 %v444_v22, %v446_v23 }
 0x291   :  { %v417_v26 = vadd.f32 %v416_v24, %v415_v21  ;;  %v449_v27 = vrot.slane %v448_v25, 4 }
 0x293   :  { %v418_v28 = vrot.slane %v417_v26, 2  ;;  %v450_v29 = vmax.f32 %v448_v25, %v449_v27 }
 0x295   :  { %v419_v30 = vadd.f32 %v418_v28, %v417_v26  ;;  %v451_v31 = vrot.slane %v450_v29, 2 }
 0x297   :  { %v420_v32 = vrot.slane %v419_v30, 1  ;;  %v452_v33 = vmax.f32 %v450_v29, %v451_v31 }
 0x299   :  { %v421_v34 = vadd.f32 %v420_v32, %v419_v30  ;;  %v453_v35 = vrot.slane %v452_v33, 1 }
 0x29b   :  { %631 = vlog2.f32 %v421_v34  ;;  %v454_v36 = vmax.f32 %v452_v33, %v453_v35 }
 0x29d   :  { %v455_v37 = vsub.f32 %v444_v22, %v454_v36  ;;  %v456_v38 = vsub.f32 %v446_v23, %v454_v36 }
 0x29f   :  { %v457_v39 = vmul.f32 1.442695, %v455_v37  ;;  %v459_v40 = vmul.f32 1.442695, %v456_v38 }
 0x2a1   :  { %v632_v41 = vpop.eup %631  ;;  %633 = vpow2.f32 %v457_v39 }
 0x2a2   :  { %v423_v42 = vmul.f32 0.6931472, %v632_v41  ;;  %635 = vpow2.f32 %v459_v40 }
 0x2a4   :  { %v424_v43 = vsub.f32 %v409_v13, %v423_v42  ;;  %v425_v44 = vsub.f32 %v410_v14, %v423_v42 }
 0x2a6   :  { %426 = vst [vmem:[#allocation11] sm:$0xff] %v424_v43 }
 0x2a7   :  { %v634_v45 = vpop.eup %633  ;;  %427 = vst [vmem:[#allocation11 + $0x8] sm:$0xff] %v425_v44 }
 0x2a8   :  { %v636_v46 = vpop.eup %635 }
 0x2a9   :  { %v461_v47 = vadd.f32 %v636_v46, %v634_v45 }
 0x2ab   :  { %v462_v48 = vrot.slane %v461_v47, 4 }
 0x2ad   :  { %v463_v49 = vadd.f32 %v462_v48, %v461_v47 }
 0x2af   :  { %v464_v50 = vrot.slane %v463_v49, 2 }
 0x2b1   :  { %v465_v51 = vadd.f32 %v464_v50, %v463_v49 }
 0x2b3   :  { %v466_v52 = vrot.slane %v465_v51, 1 }
 0x2b5   :  { %v467_v53 = vadd.f32 %v466_v52, %v465_v51 }
 0x2b7   :  { %637 = vlog2.f32 %v467_v53 }
 0x2bd   :  { %v638_v54 = vpop.eup %637 }
 0x2be   :  { %v469_v55 = vmul.f32 0.6931472, %v638_v54 }
 0x2c0   :  { %v470_v56 = vsub.f32 %v455_v37, %v469_v55  ;;  %v471_v57 = vsub.f32 %v456_v38, %v469_v55 }
 0x2c2   :  { %472 = vst [vmem:[#allocation11 + $0x10] sm:$0xff] %v470_v56 }
 0x2c3   :  { %473 = vst [vmem:[#allocation11 + $0x18] sm:$0xff] %v471_v57 }
 0x2c4   :  { %486 = dma.vmem_to_hbm [thread:$0]  %s479_s18, 512, %s481_s21, [#allocation5], %s774_s22, %s774_s22, %s775_s23  }
 0x2c5   :  { %765 = dma.done.wait [#allocation5], 512  }
 0x2c6   :  { %766 = vsyncadd [#allocation5], 4294966784 }
 0x2c7   :  { %491 = vsyncpa [#allocation4], 1 }
 0x2c8   :  { %492 = vsyncpa [#allocation7], 1 }
 0x2c9   :  { %493 = vsyncpa [#allocation10], 1 }
 0x2ca   :  { %494 = vsyncpa [#allocation5], 1 }

</bundles_post_ra>
